<compile_context>
chip_gen: v6e
topology: v6e:2x2x1
jax: 0.10.0
libtpu: 0.0.40
codegen_flags: <defaults>
</compile_context>

<pallas_src>
import jax
import jax.numpy as jnp
from jax import lax
from jax.experimental import pallas as pl
from jax.experimental.pallas import tpu as pltpu


def _conv1d_vpu_kernel(w_ref, b_ref, x_ref, o_ref):
    """Direct 1-D convolution (valid padding, stride 1), VPU-only.

    w_ref : SMEM (C_out*C_in*K,) flat f32 weight scalars (row-major OIK)
    b_ref : SMEM (C_out,)        f32 bias scalars
    x_ref : VMEM (N, C_in, L)
    o_ref : VMEM (N, C_out, L_out), L_out = L - K + 1
    """
    n, c_out, l_out = o_ref.shape
    _, c_in, l = x_ref.shape
    k_size = l - l_out + 1

    # Fully static unroll over the tiny (N, C_out, C_in, K) extents:
    # each term is one SMEM scalar splat * one lane-slice of x -> VPU FMA.
    for nb in range(n):
        for o in range(c_out):
            acc = jnp.zeros((1, 1, l_out), jnp.float32)
            for c in range(c_in):
                for k in range(k_size):
                    w_s = w_ref[(o * c_in + c) * k_size + k]       # SMEM scalar
                    xk = x_ref[nb:nb + 1, c:c + 1, k:k + l_out]    # ref lane-slice
                    acc = acc + w_s * xk
            o_ref[nb:nb + 1, o:o + 1, :] = (acc + b_ref[o]).astype(o_ref.dtype)


def conv1d_pallas(x, weight, bias):
    """conv1d(x, weight, bias), valid padding, stride 1 (PyTorch NCW layout).

    x: (N, C_in, L) f32; weight: (C_out, C_in, K) f32; bias: (C_out,) f32.
    Returns (N, C_out, L - K + 1) f32.
    """
    n, c_in, l = x.shape
    c_out, c_in_w, k = weight.shape
    assert c_in == c_in_w
    l_out = l - k + 1

    return pl.pallas_call(
        _conv1d_vpu_kernel,
        out_shape=jax.ShapeDtypeStruct((n, c_out, l_out), jnp.float32),
        in_specs=[
            pl.BlockSpec(memory_space=pltpu.MemorySpace.SMEM),   # flat weights
            pl.BlockSpec(memory_space=pltpu.MemorySpace.SMEM),   # bias
            pl.BlockSpec(memory_space=pltpu.MemorySpace.VMEM),   # x
        ],
        out_specs=pl.BlockSpec(memory_space=pltpu.MemorySpace.VMEM),
    )(weight.reshape(-1), bias, x)


class Model:
    """JAX/Pallas port of the reference torch Model."""

    def __init__(self, key):
        c_in, c_out, k = 2, 2, 3
        kw, kb = jax.random.split(key)
        # Deterministic PyTorch-style uniform init: U(-1/sqrt(fan_in*k), +...)
        bound = 1.0 / (c_in * k) ** 0.5
        self.conv_w = jax.random.uniform(
            kw, (c_out, c_in, k), jnp.float32, -bound, bound)
        self.conv_b = jax.random.uniform(
            kb, (c_out,), jnp.float32, -bound, bound)
        # BatchNorm1d(2) parameters / running stats (PyTorch defaults).
        self.bn_weight = jnp.ones((c_out,), jnp.float32)
        self.bn_bias = jnp.zeros((c_out,), jnp.float32)
        self.bn_running_mean = jnp.zeros((c_out,), jnp.float32)
        self.bn_running_var = jnp.ones((c_out,), jnp.float32)

    def forward(self, x):
        # The reference computes y1 = batch_norm(x1) and y2 = F.batch_norm(x2)
        # but discards both; only (x1, x2) are returned.  x1 and x2 are the
        # same convolution of the same input, so compute it once and return
        # it twice.
        # TODO(synk): the training-mode batch_norm's running_mean/var update
        # side effect is not modeled (it does not affect returned values).
        x1 = conv1d_pallas(x, self.conv_w, self.conv_b)
        return (x1, x1)


if __name__ == "__main__":
    key = jax.random.PRNGKey(0)
    k_model, k_x = jax.random.split(key)

    model = Model(k_model)
    x = jax.random.normal(k_x, (1, 2, 8), jnp.float32)  # NCW, matches torch spec

    x1, x2 = model.forward(x)
    jax.block_until_ready((x1, x2))

    # Sanity check against a plain-JAX reference convolution.
    ref = lax.conv_general_dilated(
        x, model.conv_w, window_strides=(1,), padding="VALID",
        dimension_numbers=("NCH", "OIH", "NCH"),
    ) + model.conv_b.reshape(1, -1, 1)
    assert x1.shape == (1, 2, 6) and x2.shape == (1, 2, 6)
    assert jnp.allclose(x1, ref, atol=1e-5), "x1 mismatch vs reference conv"
    assert jnp.allclose(x2, ref, atol=1e-5), "x2 mismatch vs reference conv"

    print("KERNEL_OK")
</pallas_src>

<mosaic_0001>
module attributes {stable_mosaic.version = 11 : i64} {
  func.func @_conv1d_vpu_kernel(%arg0: memref<12xf32, #tpu.memory_space<smem>>, %arg1: memref<2xf32, #tpu.memory_space<smem>>, %arg2: memref<1x2x8xf32, #tpu.memory_space<vmem>>, %arg3: memref<1x2x6xf32, #tpu.memory_space<vmem>>) attributes {dimension_semantics = [], scalar_prefetch = 0 : i64, scratch_operands = 0 : i64, tpu.core_type = #tpu.core_type<tc>} {
    %cst = arith.constant 0.000000e+00 : f32
    %0 = vector.broadcast %cst : f32 to vector<1x1x6xf32>
    %c0 = arith.constant 0 : index
    %1 = memref.load %arg0[%c0] : memref<12xf32, #tpu.memory_space<smem>>
    %c0_0 = arith.constant 0 : index
    %c0_1 = arith.constant 0 : index
    %c0_2 = arith.constant 0 : index
    %2 = vector.load %arg2[%c0_0, %c0_1, %c0_2] : memref<1x2x8xf32, #tpu.memory_space<vmem>>, vector<1x1x6xf32>
    %3 = vector.broadcast %1 : f32 to vector<1x1x6xf32>
    %4 = arith.mulf %3, %2 : vector<1x1x6xf32>
    %5 = arith.addf %0, %4 : vector<1x1x6xf32>
    %c1 = arith.constant 1 : index
    %6 = memref.load %arg0[%c1] : memref<12xf32, #tpu.memory_space<smem>>
    %c0_3 = arith.constant 0 : index
    %c0_4 = arith.constant 0 : index
    %c1_5 = arith.constant 1 : index
    %7 = vector.load %arg2[%c0_3, %c0_4, %c1_5] : memref<1x2x8xf32, #tpu.memory_space<vmem>>, vector<1x1x6xf32>
    %8 = vector.broadcast %6 : f32 to vector<1x1x6xf32>
    %9 = arith.mulf %8, %7 : vector<1x1x6xf32>
    %10 = arith.addf %5, %9 : vector<1x1x6xf32>
    %c2 = arith.constant 2 : index
    %11 = memref.load %arg0[%c2] : memref<12xf32, #tpu.memory_space<smem>>
    %c0_6 = arith.constant 0 : index
    %c0_7 = arith.constant 0 : index
    %c2_8 = arith.constant 2 : index
    %12 = vector.load %arg2[%c0_6, %c0_7, %c2_8] : memref<1x2x8xf32, #tpu.memory_space<vmem>>, vector<1x1x6xf32>
    %13 = vector.broadcast %11 : f32 to vector<1x1x6xf32>
    %14 = arith.mulf %13, %12 : vector<1x1x6xf32>
    %15 = arith.addf %10, %14 : vector<1x1x6xf32>
    %c3 = arith.constant 3 : index
    %16 = memref.load %arg0[%c3] : memref<12xf32, #tpu.memory_space<smem>>
    %c0_9 = arith.constant 0 : index
    %c1_10 = arith.constant 1 : index
    %c0_11 = arith.constant 0 : index
    %17 = vector.load %arg2[%c0_9, %c1_10, %c0_11] : memref<1x2x8xf32, #tpu.memory_space<vmem>>, vector<1x1x6xf32>
    %18 = vector.broadcast %16 : f32 to vector<1x1x6xf32>
    %19 = arith.mulf %18, %17 : vector<1x1x6xf32>
    %20 = arith.addf %15, %19 : vector<1x1x6xf32>
    %c4 = arith.constant 4 : index
    %21 = memref.load %arg0[%c4] : memref<12xf32, #tpu.memory_space<smem>>
    %c0_12 = arith.constant 0 : index
    %c1_13 = arith.constant 1 : index
    %c1_14 = arith.constant 1 : index
    %22 = vector.load %arg2[%c0_12, %c1_13, %c1_14] : memref<1x2x8xf32, #tpu.memory_space<vmem>>, vector<1x1x6xf32>
    %23 = vector.broadcast %21 : f32 to vector<1x1x6xf32>
    %24 = arith.mulf %23, %22 : vector<1x1x6xf32>
    %25 = arith.addf %20, %24 : vector<1x1x6xf32>
    %c5 = arith.constant 5 : index
    %26 = memref.load %arg0[%c5] : memref<12xf32, #tpu.memory_space<smem>>
    %c0_15 = arith.constant 0 : index
    %c1_16 = arith.constant 1 : index
    %c2_17 = arith.constant 2 : index
    %27 = vector.load %arg2[%c0_15, %c1_16, %c2_17] : memref<1x2x8xf32, #tpu.memory_space<vmem>>, vector<1x1x6xf32>
    %28 = vector.broadcast %26 : f32 to vector<1x1x6xf32>
    %29 = arith.mulf %28, %27 : vector<1x1x6xf32>
    %30 = arith.addf %25, %29 : vector<1x1x6xf32>
    %c0_18 = arith.constant 0 : index
    %31 = memref.load %arg1[%c0_18] : memref<2xf32, #tpu.memory_space<smem>>
    %32 = vector.broadcast %31 : f32 to vector<1x1x6xf32>
    %33 = arith.addf %30, %32 : vector<1x1x6xf32>
    %c0_19 = arith.constant 0 : index
    %c0_20 = arith.constant 0 : index
    %c0_21 = arith.constant 0 : index
    %34 = vector.load %arg3[%c0_19, %c0_20, %c0_21] : memref<1x2x6xf32, #tpu.memory_space<vmem>>, vector<1x1x6xf32>
    tpu.vector_store %arg3[%c0_19, %c0_20, %c0_21], %33 {strides = array<i32>} : memref<1x2x6xf32, #tpu.memory_space<vmem>>, vector<1x1x6xf32>,
    %cst_22 = arith.constant 0.000000e+00 : f32
    %35 = vector.broadcast %cst_22 : f32 to vector<1x1x6xf32>
    %c6 = arith.constant 6 : index
    %36 = memref.load %arg0[%c6] : memref<12xf32, #tpu.memory_space<smem>>
    %c0_23 = arith.constant 0 : index
    %c0_24 = arith.constant 0 : index
    %c0_25 = arith.constant 0 : index
    %37 = vector.load %arg2[%c0_23, %c0_24, %c0_25] : memref<1x2x8xf32, #tpu.memory_space<vmem>>, vector<1x1x6xf32>
    %38 = vector.broadcast %36 : f32 to vector<1x1x6xf32>
    %39 = arith.mulf %38, %37 : vector<1x1x6xf32>
    %40 = arith.addf %35, %39 : vector<1x1x6xf32>
    %c7 = arith.constant 7 : index
    %41 = memref.load %arg0[%c7] : memref<12xf32, #tpu.memory_space<smem>>
    %c0_26 = arith.constant 0 : index
    %c0_27 = arith.constant 0 : index
    %c1_28 = arith.constant 1 : index
    %42 = vector.load %arg2[%c0_26, %c0_27, %c1_28] : memref<1x2x8xf32, #tpu.memory_space<vmem>>, vector<1x1x6xf32>
    %43 = vector.broadcast %41 : f32 to vector<1x1x6xf32>
    %44 = arith.mulf %43, %42 : vector<1x1x6xf32>
    %45 = arith.addf %40, %44 : vector<1x1x6xf32>
    %c8 = arith.constant 8 : index
    %46 = memref.load %arg0[%c8] : memref<12xf32, #tpu.memory_space<smem>>
    %c0_29 = arith.constant 0 : index
    %c0_30 = arith.constant 0 : index
    %c2_31 = arith.constant 2 : index
    %47 = vector.load %arg2[%c0_29, %c0_30, %c2_31] : memref<1x2x8xf32, #tpu.memory_space<vmem>>, vector<1x1x6xf32>
    %48 = vector.broadcast %46 : f32 to vector<1x1x6xf32>
    %49 = arith.mulf %48, %47 : vector<1x1x6xf32>
    %50 = arith.addf %45, %49 : vector<1x1x6xf32>
    %c9 = arith.constant 9 : index
    %51 = memref.load %arg0[%c9] : memref<12xf32, #tpu.memory_space<smem>>
    %c0_32 = arith.constant 0 : index
    %c1_33 = arith.constant 1 : index
    %c0_34 = arith.constant 0 : index
    %52 = vector.load %arg2[%c0_32, %c1_33, %c0_34] : memref<1x2x8xf32, #tpu.memory_space<vmem>>, vector<1x1x6xf32>
    %53 = vector.broadcast %51 : f32 to vector<1x1x6xf32>
    %54 = arith.mulf %53, %52 : vector<1x1x6xf32>
    %55 = arith.addf %50, %54 : vector<1x1x6xf32>
    %c10 = arith.constant 10 : index
    %56 = memref.load %arg0[%c10] : memref<12xf32, #tpu.memory_space<smem>>
    %c0_35 = arith.constant 0 : index
    %c1_36 = arith.constant 1 : index
    %c1_37 = arith.constant 1 : index
    %57 = vector.load %arg2[%c0_35, %c1_36, %c1_37] : memref<1x2x8xf32, #tpu.memory_space<vmem>>, vector<1x1x6xf32>
    %58 = vector.broadcast %56 : f32 to vector<1x1x6xf32>
    %59 = arith.mulf %58, %57 : vector<1x1x6xf32>
    %60 = arith.addf %55, %59 : vector<1x1x6xf32>
    %c11 = arith.constant 11 : index
    %61 = memref.load %arg0[%c11] : memref<12xf32, #tpu.memory_space<smem>>
    %c0_38 = arith.constant 0 : index
    %c1_39 = arith.constant 1 : index
    %c2_40 = arith.constant 2 : index
    %62 = vector.load %arg2[%c0_38, %c1_39, %c2_40] : memref<1x2x8xf32, #tpu.memory_space<vmem>>, vector<1x1x6xf32>
    %63 = vector.broadcast %61 : f32 to vector<1x1x6xf32>
    %64 = arith.mulf %63, %62 : vector<1x1x6xf32>
    %65 = arith.addf %60, %64 : vector<1x1x6xf32>
    %c1_41 = arith.constant 1 : index
    %66 = memref.load %arg1[%c1_41] : memref<2xf32, #tpu.memory_space<smem>>
    %67 = vector.broadcast %66 : f32 to vector<1x1x6xf32>
    %68 = arith.addf %65, %67 : vector<1x1x6xf32>
    %c0_42 = arith.constant 0 : index
    %c1_43 = arith.constant 1 : index
    %c0_44 = arith.constant 0 : index
    %69 = vector.load %arg3[%c0_42, %c1_43, %c0_44] : memref<1x2x6xf32, #tpu.memory_space<vmem>>, vector<1x1x6xf32>
    tpu.vector_store %arg3[%c0_42, %c1_43, %c0_44], %68 {strides = array<i32>} : memref<1x2x6xf32, #tpu.memory_space<vmem>>, vector<1x1x6xf32>,
    return
  }
}

</mosaic_0001>

<bundles_post_ra>
// kernel: tpu_custom_call.1
= control target key start
LH: loop header
LB: loop body
LE: loop exit
PB: predicated region body
PF: predicated region fallthrough
CT: control target
= control target key end

     0   :  { %8 = vsyncpa [#allocation4], 0  ;;  %s256_s0 = inlined_call_operand.hbm [shape: f32[12], index: 0, kind: input, shape index: {}]   ;;  %s257_s1 = inlined_call_operand.vmem [shape: f32[2], index: 1, kind: input, shape index: {}]   ;;  %s258_s2 = inlined_call_operand.vmem [shape: f32[1,2,8], index: 2, kind: input, shape index: {}]   ;;  %s259_s3 = inlined_call_operand.hbm [shape: f32[1,2,6], index: 3, kind: output, shape index: {}]  }
   0x1   :  { %9 = vsyncpa [#allocation5], 0 }
   0x2   :  { %10 = vsyncpa [#allocation3], 0  ;;  %s25_s14 = sshll.u32 %s257_s1, 4  ;;  %s210_s15 = smov [#allocation2]   ;;  %s26_s14 = int_to_ptr.vmem [resolvable:$true] %s25_s14 }
   0x3   :  { %18 = dma.hbm_to_smem %s256_s0, 16, %s210_s15, [#allocation4]  }
   0x4   :  { %s172_s18 = scalar_lea.vmem %s26_s14, 16  ;;  %p177_p1 = scmp.lt.s32.totalorder %s26_s14, %s26_s14 }
   0x5   :  { %p173_p0 = scmp.ne.s32.totalorder %s26_s14, %s172_s18  ;;  %p178_p2 = scmp.lt.s32.totalorder %s172_s18, %s172_s18 }
   0x7   :  { %p179_p3 = por %p178_p2, %p177_p1 }
   0x9   :  { %p180_p4 = pnand %p179_p3, %p173_p0 }
   0xb   :  { %183 = shalt.err (!%p180_p4)
}
   0xc   :  { %s211_s19 = smov [#allocation6]  }
   0xd   :  { %28 = dma.vmem_to_smem %s26_s14, 16, %s211_s19, [#allocation5]  }
   0xe   :  { %204 = dma.done.wait [#allocation4], 16  }
   0xf   :  { %205 = vsyncadd [#allocation4], 4294967280 }
  0x10   :  { %206 = dma.done.wait [#allocation5], 16  }
  0x11   :  { %207 = vsyncadd [#allocation5], 4294967280 }
  0x12   :  { %37 = sfence }
  0x13   :  { %s148_s1 = sld [smem:[#allocation2 + $0x2]]  ;;  %v39_v0 = vld [vmem:[%s258_s2] sm:$0x1]  ;;  %s212_s30 = smov 126   ;;  %v107_v10 = vld [vmem:[%s258_s2 + $0x1] sm:$0x1] }
  0x14   :  { %s147_s20 = sld [smem:[#allocation2 + $0x1]]  ;;  %v86_v2 = vld [vmem:[%s258_s2] sm:$0x1]  ;;  %s213_s4 = smov 127   ;;  %v60_v12 = vld [vmem:[%s258_s2 + $0x1] sm:$0x1] }
  0x15   :  { %s154_s21 = sld [smem:[#allocation2 + $0x8]]  ;;  %s214_s14 = smov [#allocation7]   ;;  %vm83_vm0 = vcmask 40960  }
  0x16   :  { %s153_s22 = sld [smem:[#allocation2 + $0x7]]  ;;  %s137_s15 = sshll.u32 %s214_s14, 4  ;;  %s138_s15 = int_to_ptr.vmem [resolvable:$true] %s137_s15 }
  0x17   :  { %s156_s24 = sld [smem:[#allocation2 + $0xa]]  ;;  %s184_s16 = scalar_lea.vmem %s138_s15, 32 }
  0x18   :  { %s150_s25 = sld [smem:[#allocation2 + $0x4]]  ;;  %p185_p5 = scmp.ne.s32.totalorder %s138_s15, %s184_s16 }
  0x19   :  { %v52_v1 = vstv %s148_s1  ;;  %s157_s28 = sld [smem:[#allocation2 + $0xb]]  ;;  %p189_p6 = scmp.lt.s32.totalorder %s138_s15, %s138_s15 }
  0x1a   :  { %v53_v3 = vmul.f32 %v52_v1, %v39_v0  ;;  %v44_v4 = vstv %s147_s20  ;;  %s151_s29 = sld [smem:[#allocation2 + $0x5]]  ;;  %p190_p7 = scmp.lt.s32.totalorder %s184_s16, %s184_s16 }
  0x1b   :  { %v45_v5 = vmul.f32 %v44_v4, %v39_v0  ;;  %v99_v6 = vstv %s154_s21  ;;  %s38_s9 = sld [smem:[#allocation2]] }
  0x1c   :  { %55 = vrot.lane.b32.xlu1 %v53_v3, %s212_s30  ;;  %v100_v7 = vmul.f32 %v99_v6, %v86_v2  ;;  %v91_v8 = vstv %s153_s22  ;;  %s152_s10 = sld [smem:[#allocation2 + $0x6]]  ;;  %p191_p8 = por %p190_p7, %p189_p6 }
  0x1d   :  { %47 = vrot.lane.b32.xlu0 %v45_v5, %s213_s4  ;;  %v92_v9 = vmul.f32 %v91_v8, %v86_v2  ;;  %v112_v11 = vstv %s156_s24  ;;  %s149_s11 = sld [smem:[#allocation2 + $0x3]] }
  0x1e   :  { %v65_v13 = vstv %s150_s25  ;;  %v113_v14 = vmul.f32 %v112_v11, %v107_v10  ;;  %s155_s12 = sld [smem:[#allocation2 + $0x9]]  ;;  %p192_p9 = pnand %p191_p8, %p185_p5 }
  0x1f   :  { %v66_v15 = vmul.f32 %v65_v13, %v60_v12  ;;  %v120_v16 = vstv %s157_s28  ;;  %s158_s2 = sld [smem:[#allocation6 + $0x1]] }
  0x20   :  { %102 = vrot.lane.b32.xlu1 %v100_v7, %s212_s30  ;;  %v73_v17 = vstv %s151_s29  ;;  %v121_v18 = vmul.f32 %v120_v16, %v107_v10  ;;  %s80_s13 = sld [smem:[#allocation6]] }
  0x21   :  { %94 = vrot.lane.b32.xlu0 %v92_v9, %s213_s4  ;;  %v74_v19 = vmul.f32 %v73_v17, %v60_v12  ;;  %v40_v20 = vstv %s38_s9 }
  0x22   :  { %v41_v21 = vmul.f32 %v40_v20, %v39_v0  ;;  %v87_v22 = vstv %s152_s10 }
  0x23   :  { %v61_v23 = vstv %s149_s11  ;;  %v88_v27 = vmul.f32 %v87_v22, %v86_v2 }
  0x24   :  { %115 = vrot.lane.b32.xlu1 %v113_v14, %s213_s4  ;;  %v62_v28 = vmul.f32 %v61_v23, %v60_v12  ;;  %v108_v29 = vstv %s155_s12 }
  0x25   :  { %68 = vrot.lane.b32.xlu0 %v66_v15, %s213_s4  ;;  %v109_v34 = vmul.f32 %v108_v29, %v107_v10  ;;  %v128_v43 = vstv %s158_s2 }
  0x26   :  { %v81_v44 = vstv %s80_s13 }
  0x28   :  { %123 = vrot.lane.b32.xlu1 %v121_v18, %s212_s30 }
  0x29   :  { %76 = vrot.lane.b32.xlu0 %v74_v19, %s212_s30 }
  0x8e   :  { %v56_v24 = vpop.permute.xlu1 %55 }
  0x8f   :  { %v48_v25 = vpop.permute.xlu0 %47 }
  0x90   :  { %v50_v26 = vadd.f32 %v48_v25, %v41_v21 }
  0x92   :  { %v58_v30 = vadd.f32 %v56_v24, %v50_v26  ;;  %v103_v31 = vpop.permute.xlu1 %102 }
  0x93   :  { %v95_v32 = vpop.permute.xlu0 %94 }
  0x94   :  { %v97_v33 = vadd.f32 %v95_v32, %v88_v27  ;;  %v63_v35 = vadd.f32 %v62_v28, %v58_v30 }
  0x96   :  { %v105_v36 = vadd.f32 %v103_v31, %v97_v33  ;;  %v116_v37 = vpop.permute.xlu1 %115 }
  0x97   :  { %v69_v38 = vpop.permute.xlu0 %68 }
  0x98   :  { %v110_v39 = vadd.f32 %v109_v34, %v105_v36  ;;  %v71_v41 = vadd.f32 %v69_v38, %v63_v35 }
  0x9a   :  { %v118_v40 = vadd.f32 %v116_v37, %v110_v39  ;;  %v124_v42 = vpop.permute.xlu1 %123 }
  0x9b   :  { %v77_v45 = vpop.permute.xlu0 %76 }
  0x9c   :  { %v126_v46 = vadd.f32 %v124_v42, %v118_v40  ;;  %v79_v47 = vadd.f32 %v77_v45, %v71_v41 }
  0x9e   :  { %v129_v48 = vadd.f32 %v128_v43, %v126_v46  ;;  %v82_v49 = vadd.f32 %v81_v44, %v79_v47 }
  0xa0   :  { %84 = vst.msk [vmem:[#allocation7] sm:$0x1] %vm83_vm0, %v82_v49  ;;  %130 = vst.msk [vmem:[#allocation7 + $0x1] sm:$0x1] %vm83_vm0, %v129_v48 }
  0xa1   :  { %195 = shalt.err (!%p192_p9)
}
  0xa2   :  { %140 = dma.vmem_to_hbm [thread:$0]  %s138_s15, 32, %s259_s3, [#allocation3]  }
  0xa3   :  { %208 = dma.done.wait [#allocation3], 32  }
  0xa4   :  { %209 = vsyncadd [#allocation3], 4294967264 }
  0xa5   :  { %144 = vsyncpa [#allocation3], 1 }
  0xa6   :  { %145 = vsyncpa [#allocation4], 1 }
  0xa7   :  { %146 = vsyncpa [#allocation5], 1 }

</bundles_post_ra>
